<compile_context>
chip_gen: v5e
topology: v5e:2x2
jax: 0.10.0
libtpu: 0.0.40
codegen_flags: <defaults>
</compile_context>

<pallas_src>
import functools

import jax
import jax.numpy as jnp
import numpy as np
from jax.experimental import pallas as pl
from jax.experimental.pallas import tpu as pltpu


# ----------------------------------------------------------------------------- kernel


def hierarchy_gcn_kernel(
    x_ref,     # (TB, N, D)  batch block
    ws_ref,    # (2, N, N)   [origin_adj*adj ; origin_adj.T*out_adj] stacked on a leading axis
    eb_ref,    # (N, D)      edge_bias
    oeb_ref,   # (N, D)      out_edge_bias
    gw_ref,    # (3, D)      [gate_weight ; out_gate_weight ; loop_gate]^T
    gb_ref,    # (3, N, 1)   [bias_gate ; out_bias_gate ; 0]
    o_ref,     # (TB, N, D)  output
    *,
    vpu_arcs: bool,
):
    h = x_ref[...].astype(jnp.float32)                       # (TB, N, D)

    # inputs_norm = inputs / ||inputs|| via rsqrt (EUP slot).  No eps, matching
    # the torch module (an all-zero node row is NaN there too).
    inv_norm = jax.lax.rsqrt(jnp.sum(h * h, axis=-1, keepdims=True))   # (TB, N, 1)
    hn = h * inv_norm                                        # (TB, N, D) f32

    if vpu_arcs:
        # Small-N path: sim and both arc contractions as VPU broadcast-multiply
        # + XLU reduce, all f32 (tiny N makes MXU pushes almost empty).
        sim = jnp.abs(
            jnp.sum(hn[:, :, None, :] * hn[:, None, :, :], axis=-1))   # (TB, N, N)
        w = ws_ref[...].astype(jnp.float32)                  # (2, N, N)
        ws_eff = w[None, :, :, :] * sim[:, None, :, :]       # (TB, 2, N, N)
        # h_io[b,k,n,d] = sum_m ws_eff[b,k,n,m] * h[b,m,d]
        h_io = jnp.sum(ws_eff[..., None] * h[:, None, None, :, :], axis=3)  # (TB, 2, N, D)
        h_in = h_io[:, 0]                                    # leading-axis views, zero-cost
        h_out = h_io[:, 1]
    else:
        # Large-N path: bf16 MXU operands, f32 accumulation.  Arcs stay split
        # on the leading axis of ws (no concatenate, no sublane-boundary split).
        hn_b = hn.astype(jnp.bfloat16)
        sim = jnp.abs(jnp.einsum("bnd,bmd->bnm", hn_b, hn_b,
                                 preferred_element_type=jnp.float32))   # (TB, N, N)
        w = ws_ref[...].astype(jnp.float32)                  # (2, N, N) (bf16 in HBM)
        h_b = h.astype(jnp.bfloat16)
        ws_in = (w[0] * sim).astype(jnp.bfloat16)            # (TB, N, N)
        ws_out = (w[1] * sim).astype(jnp.bfloat16)
        h_in = jnp.einsum("bnm,bmd->bnd", ws_in, h_b,
                          preferred_element_type=jnp.float32)
        h_out = jnp.einsum("bnm,bmd->bnd", ws_out, h_b,
                           preferred_element_type=jnp.float32)
        # TODO(synk): for very large N additionally tile the node dim with a
        # reduction grid axis + accumulator (per-generation block sizes: v7x
        # has 64 MiB VMEM vs 128 MiB on v5e/v6e).

    # Gates: all three logits via ONE broadcast multiply + ONE XLU reduction +
    # ONE sigmoid ((N,D)@(D,1) matvecs would leave the MXU idle).
    gw = gw_ref[...]                                         # (3, D)
    gb = gb_ref[...]                                         # (3, N, 1)
    logits = jnp.sum(h[None, :, :, :] * gw[:, None, None, :],
                     axis=-1, keepdims=True)                 # (3, TB, N, 1)
    gates = jax.nn.sigmoid(logits + gb[:, None, :, :])       # (3, TB, N, 1)

    # Dropout == identity (eval mode).
    in_ = (h_in + eb_ref[...]) * gates[0]
    out_ = (h_out + oeb_ref[...]) * gates[1]
    loop_ = h * gates[2]

    o_ref[...] = jnp.maximum(in_ + out_ + loop_, 0.0).astype(o_ref.dtype)   # ReLU


# ----------------------------------------------------------------------------- wrapper


_VPU_ARC_MAX_N = 32   # below this, the MXU path is push/drain-latency dominated


def prepare_params(params):
    """One-time parameter packing, hoisted out of the per-forward path."""
    n_nodes, in_dim = params["edge_bias"].shape

    w_in = params["origin_adj"] * params["adj_matrix"]               # (N, N)
    w_out = params["origin_adj"].T * params["out_adj_matrix"]        # (N, N)
    w_stacked = jnp.stack([w_in, w_out], axis=0)                     # (2, N, N)

    use_mxu = n_nodes > _VPU_ARC_MAX_N
    if use_mxu:
        # MXU operand is bf16 anyway -> halve HBM->VMEM DMA and VMEM footprint.
        w_stacked = w_stacked.astype(jnp.bfloat16)

    gate_w = jnp.concatenate(
        [params["gate_weight"], params["out_gate_weight"], params["loop_gate"]],
        axis=1).T                                                    # (3, D)
    gate_b = jnp.stack(
        [params["bias_gate"], params["out_bias_gate"],
         jnp.zeros_like(params["bias_gate"])], axis=0)               # (3, N, 1)

    return {
        "w_stacked": w_stacked,
        "edge_bias": params["edge_bias"],
        "out_edge_bias": params["out_edge_bias"],
        "gate_w": gate_w,
        "gate_b": gate_b,
        "use_mxu": use_mxu,
    }


def _choose_batch_block(B, N, D, itemsize=4, budget_bytes=24 << 20):
    # Default: whole batch in one grid step (grid=(1,)).  v5e/v6e have a single
    # TensorCore, so a split batch grid is a serial loop that only adds per-step
    # overhead.  Split only when the (double-buffered x + out) block exceeds a
    # conservative VMEM budget that is safe on v7x's 64 MiB; then pick the
    # LARGEST divisor of B that fits (fixes the old odd-B -> B-steps fallback).
    # On v7x with large per-row work, pass batch_block explicitly to fan out
    # across the two TensorCores.
    per_row = 2 * 2 * N * D * itemsize
    for bb in range(B, 0, -1):
        if B % bb == 0 and bb * per_row <= budget_bytes:
            return bb
    return 1


def hierarchy_gcn_forward(inputs, prepared, *, batch_block=None):
    """inputs: (B, N, D) float32; prepared: output of prepare_params()."""
    B, N, D = inputs.shape

    if batch_block is None:
        batch_block = _choose_batch_block(B, N, D)
    assert B % batch_block == 0, "batch_block must divide batch size"
    grid_b = B // batch_block

    kernel = functools.partial(hierarchy_gcn_kernel,
                               vpu_arcs=not prepared["use_mxu"])

    # Grid-invariant operands: constant index_map -> single-buffered (double
    # buffering buys nothing and doubles their resident VMEM).
    def invariant(shape):
        return pl.BlockSpec(shape, lambda b: (0,) * len(shape),
                            pipeline_mode=pl.Buffered(1))

    return pl.pallas_call(
        kernel,
        out_shape=jax.ShapeDtypeStruct((B, N, D), inputs.dtype),
        grid_spec=pltpu.PrefetchScalarGridSpec(
            num_scalar_prefetch=0,
            grid=(grid_b,),
            in_specs=[
                pl.BlockSpec((batch_block, N, D), lambda b: (b, 0, 0)),  # x
                invariant((2, N, N)),   # stacked masked adjacency
                invariant((N, D)),      # edge_bias
                invariant((N, D)),      # out_edge_bias
                invariant((3, D)),      # fused gate weights
                invariant((3, N, 1)),   # fused gate biases
            ],
            out_specs=pl.BlockSpec((batch_block, N, D), lambda b: (b, 0, 0)),
        ),
        compiler_params=pltpu.CompilerParams(
            dimension_semantics=("parallel",),
            # vmem_limit_bytes left at the compiler default: the demo working
            # set is a few hundred KiB.  For large N derive a per-generation
            # limit (<= ~75% of physical VMEM; v7x has only 64 MiB per TC).
        ),
    )(inputs, prepared["w_stacked"], prepared["edge_bias"],
      prepared["out_edge_bias"], prepared["gate_w"], prepared["gate_b"])


# ----------------------------------------------------------------------------- params / reference


def make_params(key, num_nodes, in_dim):
    """Deterministic init mirroring HierarchyGCNModule.__init__/reset_parameters."""
    k_adj, k_gw, k_ogw, k_lg = jax.random.split(key, 4)

    # Synthetic hierarchy adjacency (would be provided at construction time).
    raw = jax.random.uniform(k_adj, (num_nodes, num_nodes), dtype=jnp.float32)
    mask = (raw > 0.5).astype(jnp.float32)
    in_adj = raw * mask                       # child->parent probabilities
    out_adj = in_adj.T                        # parent->child

    origin_adj = jnp.where(in_adj <= 0, in_adj, 1.0)

    # xavier_uniform_ for (in_dim, 1): bound = sqrt(6 / (fan_in + fan_out))
    bound = float(np.sqrt(6.0 / (in_dim + 1)))
    xavier = lambda k: jax.random.uniform(
        k, (in_dim, 1), minval=-bound, maxval=bound, dtype=jnp.float32)

    return {
        "adj_matrix": in_adj,
        "out_adj_matrix": out_adj,
        "origin_adj": origin_adj,
        "edge_bias": jnp.zeros((num_nodes, in_dim), jnp.float32),
        "out_edge_bias": jnp.zeros((num_nodes, in_dim), jnp.float32),
        "bias_gate": jnp.zeros((num_nodes, 1), jnp.float32),
        # out_bias_gate is never initialized in reset_parameters(); use zeros
        # deterministically here (documented deviation from torch).
        "out_bias_gate": jnp.zeros((num_nodes, 1), jnp.float32),
        "gate_weight": xavier(k_gw),
        "out_gate_weight": xavier(k_ogw),
        "loop_gate": xavier(k_lg),
    }


def reference_forward(inputs, params):
    """Pure-JAX f32 reference of the PyTorch forward (eval-mode dropout)."""
    hi = jax.lax.Precision.HIGHEST
    h = inputs
    norm = jnp.linalg.norm(h, axis=2, keepdims=True)
    hn = h / norm
    sim = jnp.abs(jnp.einsum("bnd,bmd->bnm", hn, hn, precision=hi))
    w_in = params["origin_adj"] * params["adj_matrix"]
    w_out = params["origin_adj"].T * params["out_adj_matrix"]
    h_in = jnp.einsum("bnm,bmd->bnd", w_in[None] * sim, h, precision=hi)
    in_ = h_in + params["edge_bias"]
    in_gate = jnp.einsum("bnd,de->bne", h, params["gate_weight"], precision=hi)
    in_ = in_ * jax.nn.sigmoid(in_gate + params["bias_gate"])
    h_out = jnp.einsum("bnm,bmd->bnd", w_out[None] * sim, h, precision=hi)
    out_ = h_out + params["out_edge_bias"]
    out_gate = jnp.einsum("bnd,de->bne", h, params["out_gate_weight"], precision=hi)
    out_ = out_ * jax.nn.sigmoid(out_gate + params["out_bias_gate"])
    loop_gate = jnp.einsum("bnd,de->bne", h, params["loop_gate"], precision=hi)
    loop_ = h * jax.nn.sigmoid(loop_gate)
    return jax.nn.relu(in_ + out_ + loop_)


# ----------------------------------------------------------------------------- demo


if __name__ == "__main__":
    # batch=2, num_nodes=8, in_dim=128 (D a multiple of 128 -> lane-dense I/O).
    B, N, D = 2, 8, 128

    key = jax.random.PRNGKey(0)
    k_x, k_p = jax.random.split(key)
    x = jax.random.normal(k_x, (B, N, D), dtype=jnp.float32)
    params = make_params(k_p, N, D)

    prepared = prepare_params(params)       # one-time parameter packing
    out = jax.block_until_ready(hierarchy_gcn_forward(x, prepared))

    # At demo size the kernel runs the all-f32 VPU path, so it can be checked
    # tightly against the exact f32 semantics of the torch module.
    ref = reference_forward(x, params)
    np.testing.assert_allclose(np.asarray(out), np.asarray(ref),
                               rtol=1e-4, atol=1e-4)

    print("KERNEL_OK")
</pallas_src>

<mosaic_0001>
module attributes {stable_mosaic.version = 11 : i64} {
  func.func @hierarchy_gcn_kernel(%arg0: i32, %arg1: memref<2x8x128xf32, #tpu.memory_space<vmem>>, %arg2: memref<2x8x8xf32, #tpu.memory_space<vmem>>, %arg3: memref<8x128xf32, #tpu.memory_space<vmem>>, %arg4: memref<8x128xf32, #tpu.memory_space<vmem>>, %arg5: memref<3x128xf32, #tpu.memory_space<vmem>>, %arg6: memref<3x8x1xf32, #tpu.memory_space<vmem>>, %arg7: memref<2x8x128xf32, #tpu.memory_space<vmem>>) attributes {dimension_semantics = [#tpu.dimension_semantics<parallel>], iteration_bounds = array<i64: 1>, scalar_prefetch = 0 : i64, scratch_operands = 0 : i64, tpu.core_type = #tpu.core_type<tc>, window_params = [{transform_indices = @transform_0, window_bounds = array<i64: 2, 8, 128>}, {pipeline_mode = #tpu.pipeline_mode<synchronous>, transform_indices = @transform_1, window_bounds = array<i64: 2, 8, 8>}, {pipeline_mode = #tpu.pipeline_mode<synchronous>, transform_indices = @transform_2, window_bounds = array<i64: 8, 128>}, {pipeline_mode = #tpu.pipeline_mode<synchronous>, transform_indices = @transform_3, window_bounds = array<i64: 8, 128>}, {pipeline_mode = #tpu.pipeline_mode<synchronous>, transform_indices = @transform_4, window_bounds = array<i64: 3, 128>}, {pipeline_mode = #tpu.pipeline_mode<synchronous>, transform_indices = @transform_5, window_bounds = array<i64: 3, 8, 1>}, {transform_indices = @transform_6, window_bounds = array<i64: 2, 8, 128>}]} {
    %c0 = arith.constant 0 : index
    %c0_0 = arith.constant 0 : index
    %c0_1 = arith.constant 0 : index
    %0 = vector.load %arg1[%c0, %c0_0, %c0_1] : memref<2x8x128xf32, #tpu.memory_space<vmem>>, vector<2x8x128xf32>
    %1 = arith.mulf %0, %0 : vector<2x8x128xf32>
    %cst = arith.constant dense<0.000000e+00> : vector<2x8xf32>
    %2 = vector.multi_reduction <add>, %1, %cst [2] : vector<2x8x128xf32> to vector<2x8xf32>
    %3 = vector.shape_cast %2 : vector<2x8xf32> to vector<2x8x1xf32>
    %4 = math.rsqrt %3 : vector<2x8x1xf32>
    %5 = vector.broadcast %4 : vector<2x8x1xf32> to vector<2x8x128xf32>
    %6 = arith.mulf %0, %5 : vector<2x8x128xf32>
    %7 = vector.shape_cast %6 : vector<2x8x128xf32> to vector<2x8x1x128xf32>
    %8 = vector.shape_cast %6 : vector<2x8x128xf32> to vector<2x1x8x128xf32>
    %9 = vector.broadcast %7 : vector<2x8x1x128xf32> to vector<2x8x8x128xf32>
    %10 = vector.broadcast %8 : vector<2x1x8x128xf32> to vector<2x8x8x128xf32>
    %11 = arith.mulf %9, %10 : vector<2x8x8x128xf32>
    %cst_2 = arith.constant dense<0.000000e+00> : vector<2x8x8xf32>
    %12 = vector.multi_reduction <add>, %11, %cst_2 [3] : vector<2x8x8x128xf32> to vector<2x8x8xf32>
    %13 = math.absf %12 : vector<2x8x8xf32>
    %c0_3 = arith.constant 0 : index
    %c0_4 = arith.constant 0 : index
    %c0_5 = arith.constant 0 : index
    %14 = vector.load %arg2[%c0_3, %c0_4, %c0_5] : memref<2x8x8xf32, #tpu.memory_space<vmem>>, vector<2x8x8xf32>
    %15 = vector.shape_cast %14 : vector<2x8x8xf32> to vector<1x2x8x8xf32>
    %16 = vector.shape_cast %13 : vector<2x8x8xf32> to vector<2x1x8x8xf32>
    %17 = vector.broadcast %15 : vector<1x2x8x8xf32> to vector<2x2x8x8xf32>
    %18 = vector.broadcast %16 : vector<2x1x8x8xf32> to vector<2x2x8x8xf32>
    %19 = arith.mulf %17, %18 : vector<2x2x8x8xf32>
    %20 = vector.shape_cast %19 : vector<2x2x8x8xf32> to vector<2x2x8x8x1xf32>
    %21 = vector.shape_cast %0 : vector<2x8x128xf32> to vector<2x1x1x8x128xf32>
    %22 = vector.broadcast %20 : vector<2x2x8x8x1xf32> to vector<2x2x8x8x128xf32>
    %23 = vector.broadcast %21 : vector<2x1x1x8x128xf32> to vector<2x2x8x8x128xf32>
    %24 = arith.mulf %22, %23 : vector<2x2x8x8x128xf32>
    %cst_6 = arith.constant dense<0.000000e+00> : vector<2x2x8x128xf32>
    %25 = vector.multi_reduction <add>, %24, %cst_6 [3] : vector<2x2x8x8x128xf32> to vector<2x2x8x128xf32>
    %26 = vector.extract_strided_slice %25 {offsets = [0, 0, 0, 0], sizes = [2, 1, 8, 128], strides = [1, 1, 1, 1]} : vector<2x2x8x128xf32> to vector<2x1x8x128xf32>
    %27 = vector.shape_cast %26 : vector<2x1x8x128xf32> to vector<2x8x128xf32>
    %28 = vector.extract_strided_slice %25 {offsets = [0, 1, 0, 0], sizes = [2, 1, 8, 128], strides = [1, 1, 1, 1]} : vector<2x2x8x128xf32> to vector<2x1x8x128xf32>
    %29 = vector.shape_cast %28 : vector<2x1x8x128xf32> to vector<2x8x128xf32>
    %c0_7 = arith.constant 0 : index
    %c0_8 = arith.constant 0 : index
    %30 = vector.load %arg5[%c0_7, %c0_8] : memref<3x128xf32, #tpu.memory_space<vmem>>, vector<3x128xf32>
    %c0_9 = arith.constant 0 : index
    %c0_10 = arith.constant 0 : index
    %c0_11 = arith.constant 0 : index
    %31 = vector.load %arg6[%c0_9, %c0_10, %c0_11] : memref<3x8x1xf32, #tpu.memory_space<vmem>>, vector<3x8x1xf32>
    %32 = vector.shape_cast %0 : vector<2x8x128xf32> to vector<1x2x8x128xf32>
    %33 = vector.shape_cast %30 : vector<3x128xf32> to vector<3x1x1x128xf32>
    %34 = vector.broadcast %32 : vector<1x2x8x128xf32> to vector<3x2x8x128xf32>
    %35 = vector.broadcast %33 : vector<3x1x1x128xf32> to vector<3x2x8x128xf32>
    %36 = arith.mulf %34, %35 : vector<3x2x8x128xf32>
    %cst_12 = arith.constant dense<0.000000e+00> : vector<3x2x8xf32>
    %37 = vector.multi_reduction <add>, %36, %cst_12 [3] : vector<3x2x8x128xf32> to vector<3x2x8xf32>
    %38 = vector.shape_cast %37 : vector<3x2x8xf32> to vector<3x2x8x1xf32>
    %39 = vector.shape_cast %31 : vector<3x8x1xf32> to vector<3x1x8x1xf32>
    %40 = vector.broadcast %39 : vector<3x1x8x1xf32> to vector<3x2x8x1xf32>
    %41 = arith.addf %38, %40 : vector<3x2x8x1xf32>
    %42 = arith.negf %41 : vector<3x2x8x1xf32>
    %43 = math.exp %42 : vector<3x2x8x1xf32>
    %cst_13 = arith.constant 1.000000e+00 : f32
    %44 = vector.broadcast %cst_13 : f32 to vector<3x2x8x1xf32>
    %45 = arith.addf %44, %43 : vector<3x2x8x1xf32>
    %46 = arith.divf %44, %45 : vector<3x2x8x1xf32>
    %c0_14 = arith.constant 0 : index
    %c0_15 = arith.constant 0 : index
    %47 = vector.load %arg3[%c0_14, %c0_15] : memref<8x128xf32, #tpu.memory_space<vmem>>, vector<8x128xf32>
    %48 = vector.shape_cast %47 : vector<8x128xf32> to vector<1x8x128xf32>
    %49 = vector.broadcast %48 : vector<1x8x128xf32> to vector<2x8x128xf32>
    %50 = arith.addf %27, %49 : vector<2x8x128xf32>
    %51 = vector.extract_strided_slice %46 {offsets = [0, 0, 0, 0], sizes = [1, 2, 8, 1], strides = [1, 1, 1, 1]} : vector<3x2x8x1xf32> to vector<1x2x8x1xf32>
    %52 = vector.shape_cast %51 : vector<1x2x8x1xf32> to vector<2x8x1xf32>
    %53 = vector.broadcast %52 : vector<2x8x1xf32> to vector<2x8x128xf32>
    %54 = arith.mulf %50, %53 : vector<2x8x128xf32>
    %c0_16 = arith.constant 0 : index
    %c0_17 = arith.constant 0 : index
    %55 = vector.load %arg4[%c0_16, %c0_17] : memref<8x128xf32, #tpu.memory_space<vmem>>, vector<8x128xf32>
    %56 = vector.shape_cast %55 : vector<8x128xf32> to vector<1x8x128xf32>
    %57 = vector.broadcast %56 : vector<1x8x128xf32> to vector<2x8x128xf32>
    %58 = arith.addf %29, %57 : vector<2x8x128xf32>
    %59 = vector.extract_strided_slice %46 {offsets = [1, 0, 0, 0], sizes = [1, 2, 8, 1], strides = [1, 1, 1, 1]} : vector<3x2x8x1xf32> to vector<1x2x8x1xf32>
    %60 = vector.shape_cast %59 : vector<1x2x8x1xf32> to vector<2x8x1xf32>
    %61 = vector.broadcast %60 : vector<2x8x1xf32> to vector<2x8x128xf32>
    %62 = arith.mulf %58, %61 : vector<2x8x128xf32>
    %63 = vector.extract_strided_slice %46 {offsets = [2, 0, 0, 0], sizes = [1, 2, 8, 1], strides = [1, 1, 1, 1]} : vector<3x2x8x1xf32> to vector<1x2x8x1xf32>
    %64 = vector.shape_cast %63 : vector<1x2x8x1xf32> to vector<2x8x1xf32>
    %65 = vector.broadcast %64 : vector<2x8x1xf32> to vector<2x8x128xf32>
    %66 = arith.mulf %0, %65 : vector<2x8x128xf32>
    %67 = arith.addf %54, %62 : vector<2x8x128xf32>
    %68 = arith.addf %67, %66 : vector<2x8x128xf32>
    %cst_18 = arith.constant 0.000000e+00 : f32
    %69 = vector.broadcast %cst_18 : f32 to vector<2x8x128xf32>
    %70 = arith.maximumf %68, %69 : vector<2x8x128xf32>
    %c0_19 = arith.constant 0 : index
    %c0_20 = arith.constant 0 : index
    %c0_21 = arith.constant 0 : index
    %71 = vector.load %arg7[%c0_19, %c0_20, %c0_21] : memref<2x8x128xf32, #tpu.memory_space<vmem>>, vector<2x8x128xf32>
    tpu.vector_store %arg7[%c0_19, %c0_20, %c0_21], %70 {strides = array<i32>} : memref<2x8x128xf32, #tpu.memory_space<vmem>>, vector<2x8x128xf32>,
    return
  }
  func.func @transform_0(%arg0: i32) -> (i32, i32, i32) {
    %c0_i32 = arith.constant 0 : i32
    %c0_i32_0 = arith.constant 0 : i32
    %c0_i32_1 = arith.constant 0 : i32
    return %arg0, %c0_i32, %c0_i32_0 : i32, i32, i32
  }
  func.func @transform_1(%arg0: i32) -> (i32, i32, i32) {
    %c0_i32 = arith.constant 0 : i32
    %c0_i32_0 = arith.constant 0 : i32
    %c0_i32_1 = arith.constant 0 : i32
    %c0_i32_2 = arith.constant 0 : i32
    return %c0_i32, %c0_i32_0, %c0_i32_1 : i32, i32, i32
  }
  func.func @transform_2(%arg0: i32) -> (i32, i32) {
    %c0_i32 = arith.constant 0 : i32
    %c0_i32_0 = arith.constant 0 : i32
    %c0_i32_1 = arith.constant 0 : i32
    return %c0_i32, %c0_i32_0 : i32, i32
  }
  func.func @transform_3(%arg0: i32) -> (i32, i32) {
    %c0_i32 = arith.constant 0 : i32
    %c0_i32_0 = arith.constant 0 : i32
    %c0_i32_1 = arith.constant 0 : i32
    return %c0_i32, %c0_i32_0 : i32, i32
  }
  func.func @transform_4(%arg0: i32) -> (i32, i32) {
    %c0_i32 = arith.constant 0 : i32
    %c0_i32_0 = arith.constant 0 : i32
    %c0_i32_1 = arith.constant 0 : i32
    return %c0_i32, %c0_i32_0 : i32, i32
  }
  func.func @transform_5(%arg0: i32) -> (i32, i32, i32) {
    %c0_i32 = arith.constant 0 : i32
    %c0_i32_0 = arith.constant 0 : i32
    %c0_i32_1 = arith.constant 0 : i32
    %c0_i32_2 = arith.constant 0 : i32
    return %c0_i32, %c0_i32_0, %c0_i32_1 : i32, i32, i32
  }
  func.func @transform_6(%arg0: i32) -> (i32, i32, i32) {
    %c0_i32 = arith.constant 0 : i32
    %c0_i32_0 = arith.constant 0 : i32
    %c0_i32_1 = arith.constant 0 : i32
    return %arg0, %c0_i32, %c0_i32_0 : i32, i32, i32
  }
}

</mosaic_0001>

<bundles_post_ra>
// kernel: tpu_custom_call.1
= control target key start
LH: loop header
LB: loop body
LE: loop exit
PB: predicated region body
PF: predicated region fallthrough
CT: control target
= control target key end

     0   :  { %11 = vsyncpa [#allocation3], 0  ;;  %s1830_s0 = inlined_call_operand.vmem [shape: f32[2,8,128], index: 0, kind: input, shape index: {}]   ;;  %s1831_s1 = inlined_call_operand.hbm [shape: f32[2,8,8], index: 1, kind: input, shape index: {}]   ;;  %s1832_s2 = inlined_call_operand.vmem [shape: f32[8,128], index: 2, kind: input, shape index: {}]   ;;  %s1833_s3 = inlined_call_operand.hbm [shape: f32[8,128], index: 3, kind: input, shape index: {}]   ;;  %s1834_s4 = inlined_call_operand.vmem [shape: f32[3,128], index: 4, kind: input, shape index: {}]   ;;  %s1835_s5 = inlined_call_operand.vmem [shape: f32[3,8,1], index: 5, kind: input, shape index: {}]   ;;  %s1836_s6 = inlined_call_operand.hbm [shape: f32[2,8,128], index: 6, kind: output, shape index: {}]  }
   0x1   :  { %12 = vsyncpa [#allocation6], 0 }
   0x2   :  { %13 = vsyncpa [#allocation4], 0  ;;  %s20_s23 = sshll.u32 %s1831_s1, 4  ;;  %s1319_s24 = smov [#allocation2]   ;;  %s21_s23 = int_to_ptr.hbm [resolvable:$true] %s20_s23 }
   0x3   :  { %s22_s25 = sshll.u32 %s1319_s24, 4  ;;  %s36_s28 = sshll.u32 %s1833_s3, 4  ;;  %s23_s25 = int_to_ptr.vmem [resolvable:$true] %s22_s25  ;;  %s37_s28 = int_to_ptr.hbm [resolvable:$true] %s36_s28 }
   0x4   :  { %s1320_s29 = smov 128   ;;  %s1321_s30 = smov 8  }
   0x5   :  { %28 = dma.hbm_to_vmem [thread:$0]  %s21_s23, 256, %s23_s25, [#allocation3], %s1320_s29, %s1320_s29, %s1321_s30  }
   0x6   :  { %s1322_s7 = smov [#allocation5]  }
   0x7   :  { %s38_s8 = sshll.u32 %s1322_s7, 4  ;;  %s39_s8 = int_to_ptr.vmem [resolvable:$true] %s38_s8 }
   0x8   :  { %41 = dma.hbm_to_vmem [thread:$0]  %s37_s28, 128, %s39_s8, [#allocation6]  }
   0x9   :  { %1313 = dma.done.wait [#allocation3], 256  }
   0xa   :  { %1314 = vsyncadd [#allocation3], 4294967040 }
   0xb   :  { %1315 = dma.done.wait [#allocation6], 128  }
   0xc   :  { %1316 = vsyncadd [#allocation6], 4294967168  ;;  %v1372_v0 = vld [vmem:[%s1830_s0] sm:$0xff]  ;;  %v1382_v4 = vld [vmem:[%s1830_s0 + $0x8] sm:$0xff]  ;;  %vm232_vm10 = vcmask 1041409   ;;  %vm234_vm11 = vcmask 1042434  }
   0xd   :  { %v707_v1 = vld [vmem:[%s1834_s4] sm:$0x7]  ;;  %v56_v2 = vmul.f32 %v1372_v0, %v1372_v0  ;;  %v57_v7 = vmul.f32 %v1382_v4, %v1382_v4  ;;  %vm236_vm12 = vcmask 1043459   ;;  %vm238_vm13 = vcmask 1044484   ;;  %s1178_s25 = sshll.u32 %s1836_s6, 4  ;;  %s1179_s25 = int_to_ptr.hbm [resolvable:$true] %s1178_s25 }
   0xe   :  { %v714_v3 = vperm.slane %v707_v1, 0  ;;  %v713_v8 = vrot.slane %v707_v1, 2  ;;  %v712_v9 = vrot.slane %v707_v1, 1  ;;  %v708_v54 = vld [vmem:[%s1835_s5] sm:$0xff]  ;;  %vm240_vm14 = vcmask 1045509  }
   0xf   :  { %58 = vadd.xlane.f32.xlu0 %v56_v2  ;;  %vm242_vm15 = vcmask 1046534  }
  0x10   :  { %v721_v5 = vmul.f32 %v714_v3, %v1382_v4  ;;  %v720_v6 = vmul.f32 %v714_v3, %v1372_v0  ;;  %v716_v10 = vperm.slane %v713_v8, 0  ;;  %v715_v11 = vperm.slane %v712_v9, 0 }
  0x12   :  { %728 = vadd.xlane.f32.xlu1 %v721_v5  ;;  %726 = vadd.xlane.f32.xlu2 %v720_v6  ;;  %v724_v12 = vmul.f32 %v716_v10, %v1372_v0  ;;  %v723_v13 = vmul.f32 %v715_v11, %v1382_v4  ;;  %v725_v14 = vmul.f32 %v716_v10, %v1382_v4 }
  0x13   :  { %v722_v15 = vmul.f32 %v715_v11, %v1372_v0 }
  0x17   :  { %60 = vadd.xlane.f32.xlu0 %v57_v7 }
  0x1a   :  { %734 = vadd.xlane.f32.xlu1 %v724_v12  ;;  %732 = vadd.xlane.f32.xlu2 %v723_v13 }
  0x1f   :  { %730 = vadd.xlane.f32.xlu0 %v722_v15 }
  0x22   :  { %736 = vadd.xlane.f32.xlu2 %v725_v14 }
  0x82   :  { %v59_v16 = vpop.xlane.xlu0 %58 }
  0x83   :  { %1211 = vrsqrt.f32 %v59_v16  ;;  %vm68_vm1 = vweird.f32 %v59_v16 }
  0x85   :  { %v729_v55 = vpop.xlane.xlu1 %728 }
  0x86   :  { %v1397_v56 = vadd.f32 %v729_v55, %v708_v54 }
  0x89   :  { %v1212_v17 = vpop.eup %1211 }
  0x8a   :  { %v63_v18 = vmul.f32 %v1212_v17, %v59_v16  ;;  %v61_v19 = vpop.xlane.xlu0 %60  ;;  %vm69_vm0 = vweird.f32 %v1212_v17 }
  0x8b   :  { %1213 = vrsqrt.f32 %v61_v19  ;;  %vm70_vm2 = vmor %vm68_vm1, %vm69_vm0  ;;  %vm78_vm4 = vweird.f32 %v61_v19  ;;  %vm244_vm0 = vcmask 1047559  }
  0x8c   :  { %v64_v20 = vmul.f32 %v1212_v17, %v63_v18 }
  0x8e   :  { %v65_v21 = vmul.f32 0.5, %v64_v20 }
  0x90   :  { %v66_v22 = vsub.f32 1.5, %v65_v21  ;;  %v727_v21 = vpop.xlane.xlu2 %726 }
  0x91   :  { %v1214_v23 = vpop.eup %1213 }
  0x92   :  { %v67_v24 = vmul.f32 %v1212_v17, %v66_v22  ;;  %v73_v25 = vmul.f32 %v1214_v23, %v61_v19  ;;  %vm79_vm3 = vweird.f32 %v1214_v23  ;;  %v738_v22 = vadd.f32 %v727_v21, %v708_v54 }
  0x93   :  { %vm80_vm5 = vmor %vm78_vm4, %vm79_vm3 }
  0x94   :  { %v71_v26 = vsel %vm70_vm2, %v1212_v17, %v67_v24  ;;  %v74_v27 = vmul.f32 %v1214_v23, %v73_v25 }
  0x95   :  { %v82_v28 = vmul.f32 %v71_v26, %v1372_v0 }
  0x96   :  { %v75_v29 = vmul.f32 0.5, %v74_v27 }
  0x97   :  { %v100_v30 = vperm.slane %v82_v28, 0  ;;  %v89_v31 = vrot.slane %v82_v28, 4  ;;  %v87_v32 = vrot.slane %v82_v28, 2  ;;  %v92_v40 = vrot.slane %v82_v28, 7 }
  0x98   :  { %v76_v33 = vsub.f32 1.5, %v75_v29  ;;  %v88_v41 = vrot.slane %v82_v28, 3  ;;  %v86_v48 = vrot.slane %v82_v28, 1  ;;  %v91_v51 = vrot.slane %v82_v28, 6 }
  0x99   :  { %v132_v34 = vmul.f32 %v100_v30, %v82_v28  ;;  %v104_v35 = vperm.slane %v89_v31, 0  ;;  %v102_v36 = vperm.slane %v87_v32, 0  ;;  %v107_v45 = vperm.slane %v92_v40, 0 }
  0x9a   :  { %v77_v37 = vmul.f32 %v1214_v23, %v76_v33  ;;  %v103_v46 = vperm.slane %v88_v41, 0  ;;  %v101_v53 = vperm.slane %v86_v48, 0  ;;  %v106_v57 = vperm.slane %v91_v51, 0 }
  0x9b   :  { %148 = vadd.xlane.f32.xlu1 %v132_v34  ;;  %v136_v38 = vmul.f32 %v104_v35, %v82_v28  ;;  %v134_v39 = vmul.f32 %v102_v36, %v82_v28  ;;  %v139_v49 = vmul.f32 %v107_v45, %v82_v28  ;;  %v90_v60 = vrot.slane %v82_v28, 5 }
  0x9c   :  { %v81_v42 = vsel %vm80_vm5, %v1214_v23, %v77_v37  ;;  %v135_v50 = vmul.f32 %v103_v46, %v82_v28  ;;  %v133_v59 = vmul.f32 %v101_v53, %v82_v28  ;;  %v138_v61 = vmul.f32 %v106_v57, %v82_v28  ;;  %v1400_v37 = vpop.xlane.xlu2 %732 }
  0x9d   :  { %v83_v43 = vmul.f32 %v81_v42, %v1382_v4  ;;  %156 = vadd.xlane.f32.xlu0 %v136_v38  ;;  %152 = vadd.xlane.f32.xlu2 %v134_v39  ;;  %v105_v2 = vperm.slane %v90_v60, 0  ;;  %v1192_v23 = vmul.f32 -1.442695, %v738_v22  ;;  %v1323_v32 = vmov 0   ;;  %v1402_v38 = vpop.xlane.xlu1 %734 }
  0x9e   :  { %1204 = vset.pattern.permute.xlu2 %v1323_v32  ;;  %v214_v40 = vlaneseq }
  0x9f   :  { %v108_v44 = vperm.slane %v83_v43, 0  ;;  %v94_v52 = vrot.slane %v83_v43, 2  ;;  %v97_v63 = vrot.slane %v83_v43, 5  ;;  %v93_v1 = vrot.slane %v83_v43, 1 }
  0xa0   :  { %v137_v6 = vmul.f32 %v105_v2, %v82_v28  ;;  %v95_v7 = vrot.slane %v83_v43, 3  ;;  %v96_v10 = vrot.slane %v83_v43, 4  ;;  %v98_v14 = vrot.slane %v83_v43, 6 }
  0xa1   :  { %v140_v47 = vmul.f32 %v108_v44, %v83_v43  ;;  %v110_v58 = vperm.slane %v94_v52, 0  ;;  %v113_v3 = vperm.slane %v97_v63, 0  ;;  %v109_v5 = vperm.slane %v93_v1, 0 }
  0xa2   :  { %v111_v11 = vperm.slane %v95_v7, 0  ;;  %v112_v12 = vperm.slane %v96_v10, 0  ;;  %v99_v16 = vrot.slane %v83_v43, 7  ;;  %v114_v17 = vperm.slane %v98_v14, 0 }
  0xa3   :  { %164 = vadd.xlane.f32.xlu1 %v140_v47  ;;  %v142_v62 = vmul.f32 %v110_v58, %v83_v43  ;;  %v145_v8 = vmul.f32 %v113_v3, %v83_v43  ;;  %v141_v9 = vmul.f32 %v109_v5, %v83_v43  ;;  %1215 = vpow2.f32 %v1192_v23 }
  0xa4   :  { %v143_v13 = vmul.f32 %v111_v11, %v83_v43  ;;  %v144_v15 = vmul.f32 %v112_v12, %v83_v43  ;;  %v115_v18 = vperm.slane %v99_v16, 0  ;;  %v146_v19 = vmul.f32 %v114_v17, %v83_v43  ;;  %v1404_v39 = vpop.xlane.xlu2 %736  ;;  %v196_v12 = vld [vmem:[#allocation2] sm:$0xff] }
  0xa5   :  { %162 = vadd.xlane.f32.xlu0 %v139_v49  ;;  %154 = vadd.xlane.f32.xlu2 %v135_v50  ;;  %v261_v41 = vshrl.u32 %v214_v40, 7  ;;  %v1408_v48 = vand.u32 127, %v214_v40 }
  0xa6   :  { %v147_v20 = vmul.f32 %v115_v18, %v83_v43  ;;  %v1406_v43 = vpop.xlane.xlu0 %730 }
  0xa7   :  { %1206 = vset.pattern.permute.xlu1 %v261_v41  ;;  %1205 = vset.pattern.permute.xlu0 %v261_v41 }
  0xa9   :  { %v1216_v24 = vpop.eup %1215 }
  0xaa   :  { %v762_v25 = vadd.f32 1.0, %v1216_v24 }
  0xab   :  { %150 = vadd.xlane.f32.xlu1 %v133_v59 }
  0xac   :  { %1217 = vrcp.f32 %v762_v25  ;;  %v779_v30 = vand.u32 2147483648, %v762_v25  ;;  %vm773_vm6 = vweird.f32 %v762_v25  ;;  %v777_v33 = vand.u32 2147483647, %v762_v25 }
  0xad   :  { %160 = vadd.xlane.f32.xlu2 %v138_v61  ;;  %168 = vadd.xlane.f32.xlu0 %v142_v62 }
  0xae   :  { %v780_v34 = vor.u32 1.1754944e-38, %v779_v30  ;;  %vm778_vm9 = vcmp.eq.f32.partialorder %v777_v33, 8.507059e+37 }
  0xb2   :  { %v1218_v26 = vpop.eup %1217 }
  0xb3   :  { %158 = vadd.xlane.f32.xlu1 %v137_v6  ;;  %v769_v27 = vmul.f32 %v1218_v26, %v762_v25  ;;  %vm774_vm7 = vweird.f32 %v1218_v26 }
  0xb4   :  { %vm775_vm8 = vmor %vm773_vm6, %vm774_vm7 }
  0xb5   :  { %174 = vadd.xlane.f32.xlu0 %v145_v8  ;;  %166 = vadd.xlane.f32.xlu2 %v141_v9  ;;  %v770_v28 = vsub.f32 1.0, %v769_v27 }
  0xb7   :  { %v771_v29 = vmul.f32 %v1218_v26, %v770_v28 }
  0xb9   :  { %v772_v31 = vadd.f32 %v1218_v26, %v771_v29 }
  0xbb   :  { %170 = vadd.xlane.f32.xlu1 %v143_v13  ;;  %v776_v35 = vsel %vm775_vm8, %v1218_v26, %v772_v31 }
  0xbc   :  { %v781_v36 = vsel %vm778_vm9, %v780_v34, %v776_v35  ;;  %v1427_v34 = vld [vmem:[#allocation2 + $0x8] sm:$0xff] }
  0xbd   :  { %172 = vadd.xlane.f32.xlu2 %v144_v15 }
  0xc3   :  { %176 = vadd.xlane.f32.xlu1 %v146_v19 }
  0xc5   :  { %178 = vadd.xlane.f32.xlu2 %v147_v20 }
  0xdd   :  { %893 = vperm.xlu2 %1204, %v781_v36  }
  0xe5   :  { %1207 = vset.pattern.permute.xlu2 %v261_v41 }
 0x10e   :  { %v149_v42 = vpop.xlane.xlu1 %148 }
 0x10f   :  { %v180_v49 = vand.u32 2147483647, %v149_v42 }
 0x110   :  { %v153_v44 = vpop.xlane.xlu2 %152  ;;  %v157_v47 = vpop.xlane.xlu0 %156 }
 0x111   :  { %v182_v50 = vand.u32 2147483647, %v153_v44  ;;  %v216_v53 = vperm.slane %v180_v49, %v1408_v48  ;;  %v184_v60 = vand.u32 2147483647, %v157_v47 }
 0x113   :  { %v218_v58 = vperm.slane %v182_v50, %v1408_v48  ;;  %v220_v7 = vperm.slane %v184_v60, %v1408_v48 }
 0x116   :  { %v165_v45 = vpop.xlane.xlu1 %164 }
 0x117   :  { %v188_v25 = vand.u32 2147483647, %v165_v45 }
 0x118   :  { %v155_v46 = vpop.xlane.xlu2 %154  ;;  %v163_v61 = vpop.xlane.xlu0 %162 }
 0x119   :  { %v183_v54 = vand.u32 2147483647, %v155_v46  ;;  %v187_v3 = vand.u32 2147483647, %v163_v61  ;;  %v224_v33 = vperm.slane %v188_v25, %v1408_v48 }
 0x11b   :  { %v219_v63 = vperm.slane %v183_v54, %v1408_v48  ;;  %v223_v11 = vperm.slane %v187_v3, %v1408_v48 }
 0x11e   :  { %v151_v51 = vpop.xlane.xlu1 %150 }
 0x11f   :  { %v181_v52 = vand.u32 2147483647, %v151_v51 }
 0x120   :  { %v161_v57 = vpop.xlane.xlu2 %160  ;;  %v169_v22 = vpop.xlane.xlu0 %168 }
 0x121   :  { %v217_v55 = vperm.slane %v181_v52, %v1408_v48  ;;  %v186_v1 = vand.u32 2147483647, %v161_v57  ;;  %v190_v30 = vand.u32 2147483647, %v169_v22 }
 0x123   :  { %v233_v59 = vsel %vm232_vm10, %v217_v55, %v216_v53  ;;  %v222_v9 = vperm.slane %v186_v1, %v1408_v48  ;;  %v226_v42 = vperm.slane %v190_v30, %v1408_v48 }
 0x124   :  { %v235_v62 = vsel %vm234_vm11, %v218_v58, %v233_v59 }
 0x125   :  { %v237_v5 = vsel %vm236_vm12, %v219_v63, %v235_v62 }
 0x126   :  { %v159_v2 = vpop.xlane.xlu1 %158  ;;  %v239_v10 = vsel %vm238_vm13, %v220_v7, %v237_v5  ;;  %v709_v7 = vld [vmem:[%s1835_s5 + $0x8] sm:$0xff] }
 0x127   :  { %v185_v6 = vand.u32 2147483647, %v159_v2 }
 0x128   :  { %v167_v14 = vpop.xlane.xlu2 %166  ;;  %v175_v44 = vpop.xlane.xlu0 %174 }
 0x129   :  { %v221_v8 = vperm.slane %v185_v6, %v1408_v48  ;;  %v189_v23 = vand.u32 2147483647, %v167_v14  ;;  %v193_v51 = vand.u32 2147483647, %v175_v44 }
 0x12b   :  { %v241_v13 = vsel %vm240_vm14, %v221_v8, %v239_v10  ;;  %v225_v26 = vperm.slane %v189_v23, %v1408_v48  ;;  %v229_v60 = vperm.slane %v193_v51, %v1408_v48  ;;  %v741_v10 = vadd.f32 %v1400_v37, %v709_v7 }
 0x12c   :  { %v243_v15 = vsel %vm242_vm15, %v222_v9, %v241_v13  ;;  %v710_v13 = vld [vmem:[%s1835_s5 + $0x10] sm:$0xff]  ;;  %v1193_v37 = vmul.f32 -1.442695, %v1397_v56 }
 0x12d   :  { %v245_v16 = vsel %vm244_vm0, %v223_v11, %v243_v15  ;;  %v246_v36 = vsel %vm232_vm10, %v225_v26, %v224_v33  ;;  %v1195_v11 = vmul.f32 -1.442695, %v741_v10  ;;  %v742_v23 = vadd.f32 %v1402_v38, %v710_v13 }
 0x12e   :  { %v255_v17 = vmul.f32 %v245_v16, %v196_v12  ;;  %v171_v21 = vpop.xlane.xlu1 %170  ;;  %v256_v45 = vmul.f32 %v245_v16, %v1427_v34  ;;  %v247_v46 = vsel %vm234_vm11, %v226_v42, %v246_v36 }
 0x12f   :  { %v191_v27 = vand.u32 2147483647, %v171_v21  ;;  %1219 = vpow2.f32 %v1195_v11 }
 0x130   :  { %v273_v18 = vperm.slane %v255_v17, 2  ;;  %v266_v19 = vperm.slane %v255_v17, 1  ;;  %v259_v20 = vperm.slane %v255_v17, 0  ;;  %v173_v24 = vpop.xlane.xlu2 %172  ;;  %v280_v28 = vperm.slane %v255_v17, 3 }
 0x131   :  { %v287_v29 = vperm.slane %v255_v17, 4  ;;  %v308_v31 = vperm.slane %v255_v17, 7  ;;  %v192_v35 = vand.u32 2147483647, %v173_v24  ;;  %v227_v40 = vperm.slane %v191_v27, %v1408_v48 }
 0x132   :  { %278 = vperm.xlu2 %1207, %v273_v18   ;;  %271 = vperm.xlu1 %1206, %v266_v19   ;;  %v294_v53 = vperm.slane %v255_v17, 5  ;;  %v301_v54 = vperm.slane %v255_v17, 6  ;;  %v329_v55 = vperm.slane %v256_v45, 2  ;;  %v315_v1 = vperm.slane %v256_v45, 0 }
 0x133   :  { %264 = vperm.xlu0 %1205, %v259_v20   ;;  %v228_v47 = vperm.slane %v192_v35, %v1408_v48  ;;  %v248_v52 = vsel %vm236_vm12, %v227_v40, %v247_v46  ;;  %v322_v2 = vperm.slane %v256_v45, 1  ;;  %v350_v3 = vperm.slane %v256_v45, 5 }
 0x134   :  { %v336_v8 = vperm.slane %v256_v45, 3  ;;  %v343_v9 = vperm.slane %v256_v45, 4  ;;  %v357_v14 = vperm.slane %v256_v45, 6  ;;  %v364_v15 = vperm.slane %v256_v45, 7 }
 0x135   :  { %v249_v58 = vsel %vm238_vm13, %v228_v47, %v248_v52  ;;  %v740_v17 = vadd.f32 %v1406_v43, %v709_v7  ;;  %v1220_v20 = vpop.eup %1219  ;;  %1221 = vpow2.f32 %v1193_v37 }
 0x136   :  { %v177_v41 = vpop.xlane.xlu1 %176  ;;  %v250_v61 = vsel %vm240_vm14, %v229_v60, %v249_v58  ;;  %v1454_v25 = vadd.f32 1.0, %v1220_v20 }
 0x137   :  { %v194_v49 = vand.u32 2147483647, %v177_v41  ;;  %v1194_v19 = vmul.f32 -1.442695, %v740_v17 }
 0x138   :  { %v179_v50 = vpop.xlane.xlu2 %178  ;;  %vm818_vm1 = vweird.f32 %v1454_v25  ;;  %v824_v58 = vand.u32 2147483648, %v1454_v25 }
 0x139   :  { %v195_v57 = vand.u32 2147483647, %v179_v50  ;;  %v230_v59 = vperm.slane %v194_v49, %v1408_v48 }
 0x13a   :  { %285 = vperm.xlu2 %1207, %v280_v28   ;;  %292 = vperm.xlu1 %1206, %v287_v29  }
 0x13b   :  { %313 = vperm.xlu0 %1205, %v308_v31   ;;  %v231_v62 = vperm.slane %v195_v57, %v1408_v48  ;;  %v251_v63 = vsel %vm242_vm15, %v230_v59, %v250_v61  ;;  %v1222_v43 = vpop.eup %1221  ;;  %v822_v61 = vand.u32 2147483647, %v1454_v25 }
 0x13c   :  { %v1457_v29 = vadd.f32 1.0, %v1222_v43 }
 0x13d   :  { %v252_v5 = vsel %vm244_vm0, %v231_v62, %v251_v63  ;;  %vm823_vm4 = vcmp.eq.f32.partialorder %v822_v61, 8.507059e+37 }
 0x13e   :  { %v257_v6 = vmul.f32 %v252_v5, %v196_v12  ;;  %v743_v12 = vadd.f32 %v1404_v39, %v710_v13  ;;  %v1196_v39 = vmul.f32 -1.442695, %v742_v23  ;;  %v258_v35 = vmul.f32 %v252_v5, %v1427_v34 }
 0x13f   :  { %vm788_vm5 = vweird.f32 %v1457_v29  ;;  %v794_v11 = vand.u32 2147483648, %v1457_v29 }
 0x140   :  { %v371_v48 = vperm.slane %v257_v6, 0  ;;  %v392_v16 = vperm.slane %v257_v6, 3  ;;  %v1197_v18 = vmul.f32 -1.442695, %v743_v12  ;;  %v385_v21 = vperm.slane %v257_v6, 2 }
 0x141   :  { %v378_v22 = vperm.slane %v257_v6, 1  ;;  %v413_v24 = vperm.slane %v257_v6, 6  ;;  %v406_v27 = vperm.slane %v257_v6, 5  ;;  %v399_v28 = vperm.slane %v257_v6, 4 }
 0x142   :  { %299 = vperm.xlu2 %1207, %v294_v53   ;;  %306 = vperm.xlu1 %1206, %v301_v54   ;;  %1223 = vpow2.f32 %v1197_v18  ;;  %v420_v38 = vperm.slane %v257_v6, 7  ;;  %v427_v41 = vperm.slane %v258_v35, 0  ;;  %v434_v42 = vperm.slane %v258_v35, 1  ;;  %v1519_v18 = vpop.permute.xlu2 %893 }
 0x143   :  { %334 = vperm.xlu0 %1205, %v329_v55   ;;  %1225 = vpow2.f32 %v1194_v19  ;;  %v441_v44 = vperm.slane %v258_v35, 2  ;;  %v448_v52 = vperm.slane %v258_v35, 3  ;;  %v462_v53 = vperm.slane %v258_v35, 5 }
 0x144   :  { %1227 = vrcp.f32 %v1454_v25  ;;  %v455_v57 = vperm.slane %v258_v35, 4  ;;  %v792_v12 = vand.u32 2147483647, %v1457_v29 }
 0x145   :  { %1229 = vpow2.f32 %v1196_v39  ;;  %v795_v39 = vor.u32 1.1754944e-38, %v794_v11 }
 0x146   :  { %1231 = vrcp.f32 %v1457_v29 }
 0x148   :  { %v1224_v56 = vpop.eup %1223 }
 0x149   :  { %v1226_v26 = vpop.eup %1225  ;;  %v1459_v30 = vadd.f32 1.0, %v1224_v56 }
 0x14a   :  { %320 = vperm.xlu2 %1207, %v315_v1   ;;  %327 = vperm.xlu1 %1206, %v322_v2   ;;  %v1461_v31 = vadd.f32 1.0, %v1226_v26  ;;  %v1228_v33 = vpop.eup %1227 }
 0x14b   :  { %355 = vperm.xlu0 %1205, %v350_v3   ;;  %1233 = vrcp.f32 %v1459_v30  ;;  %v1230_v36 = vpop.eup %1229  ;;  %v814_v40 = vmul.f32 %v1228_v33, %v1454_v25  ;;  %vm819_vm2 = vweird.f32 %v1228_v33  ;;  %v825_v3 = vor.u32 1.1754944e-38, %v824_v58 }
 0x14c   :  { %1235 = vrcp.f32 %v1461_v31  ;;  %v1468_v45 = vadd.f32 1.0, %v1230_v36  ;;  %v1470_v46 = vpop.eup %1231  ;;  %vm1488_vm3 = vmor %vm818_vm1, %vm819_vm2  ;;  %vm848_vm7 = vweird.f32 %v1459_v30  ;;  %vm803_vm9 = vweird.f32 %v1461_v31 }
 0x14d   :  { %v815_v34 = vsub.f32 1.0, %v814_v40  ;;  %v784_v50 = vmul.f32 %v1470_v46, %v1457_v29  ;;  %vm789_vm6 = vweird.f32 %v1470_v46  ;;  %v809_v17 = vand.u32 2147483648, %v1461_v31 }
 0x14e   :  { %1237 = vrcp.f32 %v1468_v45  ;;  %vm1512_vm2 = vmor %vm788_vm5, %vm789_vm6  ;;  %v807_v23 = vand.u32 2147483647, %v1461_v31  ;;  %vm793_vm5 = vcmp.eq.f32.partialorder %v792_v12, 8.507059e+37 }
 0x14f   :  { %v816_v51 = vmul.f32 %v1228_v33, %v815_v34  ;;  %v785_v59 = vsub.f32 1.0, %v784_v50  ;;  %v810_v56 = vor.u32 1.1754944e-38, %v809_v17 }
 0x151   :  { %v1472_v47 = vpop.eup %1233  ;;  %v817_v60 = vadd.f32 %v1228_v33, %v816_v51  ;;  %v786_v5 = vmul.f32 %v1470_v46, %v785_v59 }
 0x152   :  { %341 = vperm.xlu2 %1207, %v336_v8   ;;  %348 = vperm.xlu1 %1206, %v343_v9   ;;  %v1474_v49 = vpop.eup %1235  ;;  %v844_v54 = vmul.f32 %v1472_v47, %v1459_v30  ;;  %v469_v8 = vperm.slane %v258_v35, 6  ;;  %vm849_vm8 = vweird.f32 %v1472_v47 }
 0x153   :  { %376 = vperm.xlu0 %1205, %v371_v48   ;;  %v799_v55 = vmul.f32 %v1474_v49, %v1461_v31  ;;  %v821_v6 = vsel %vm1488_vm3, %v1228_v33, %v817_v60  ;;  %v476_v48 = vperm.slane %v258_v35, 7  ;;  %vm804_vm1 = vweird.f32 %v1474_v49  ;;  %vm1526_vm3 = vmor %vm848_vm7, %vm849_vm8 }
 0x154   :  { %v1486_v62 = vpop.eup %1237  ;;  %v845_v1 = vsub.f32 1.0, %v844_v54  ;;  %v826_v13 = vsel %vm823_vm4, %v825_v3, %v821_v6  ;;  %vm1535_vm4 = vmor %vm803_vm9, %vm804_vm1  ;;  %vm808_vm7 = vcmp.eq.f32.partialorder %v807_v23, 8.507059e+37  ;;  %vm833_vm8 = vweird.f32 %v1468_v45 }
 0x155   :  { %v800_v2 = vsub.f32 1.0, %v799_v55  ;;  %v829_v7 = vmul.f32 %v1486_v62, %v1468_v45  ;;  %vm834_vm9 = vweird.f32 %v1486_v62  ;;  %v837_v35 = vand.u32 2147483647, %v1468_v45 }
 0x156   :  { %v846_v9 = vmul.f32 %v1472_v47, %v845_v1  ;;  %vm835_vm1 = vmor %vm833_vm8, %vm834_vm9 }
 0x157   :  { %v801_v10 = vmul.f32 %v1474_v49, %v800_v2  ;;  %v830_v37 = vsub.f32 1.0, %v829_v7 }
 0x158   :  { %v847_v19 = vadd.f32 %v1472_v47, %v846_v9 }
 0x159   :  { %v831_v26 = vmul.f32 %v1486_v62, %v830_v37 }
 0x15a   :  { %362 = vperm.xlu2 %1207, %v357_v14   ;;  %369 = vperm.xlu1 %1206, %v364_v15   ;;  %v787_v14 = vadd.f32 %v1470_v46, %v786_v5 }
 0x15b   :  { %397 = vperm.xlu0 %1205, %v392_v16   ;;  %v854_v16 = vand.u32 2147483648, %v1459_v30  ;;  %v832_v33 = vadd.f32 %v1486_v62, %v831_v26  ;;  %v900_v26 = vrot.slane %v1519_v18, 2 }
 0x15c   :  { %v791_v25 = vsel %vm1512_vm2, %v1470_v46, %v787_v14  ;;  %vm838_vm2 = vcmp.eq.f32.partialorder %v837_v35, 8.507059e+37 }
 0x15d   :  { %v855_v43 = vor.u32 1.1754944e-38, %v854_v16  ;;  %v796_v29 = vsel %vm793_vm5, %v795_v39, %v791_v25 }
 0x162   :  { %390 = vperm.xlu1 %1206, %v385_v21   ;;  %383 = vperm.xlu2 %1207, %v378_v22   ;;  %v852_v21 = vand.u32 2147483647, %v1459_v30  ;;  %v802_v22 = vadd.f32 %v1474_v49, %v801_v10 }
 0x163   :  { %418 = vperm.xlu0 %1205, %v413_v24  }
 0x164   :  { %vm853_vm6 = vcmp.eq.f32.partialorder %v852_v21, 8.507059e+37 }
 0x16a   :  { %411 = vperm.xlu1 %1206, %v406_v27   ;;  %404 = vperm.xlu2 %1207, %v399_v28   ;;  %v851_v27 = vsel %vm1526_vm3, %v1472_v47, %v847_v19  ;;  %v806_v28 = vsel %vm1535_vm4, %v1474_v49, %v802_v22 }
 0x16b   :  { %425 = vperm.xlu0 %1205, %v420_v38   ;;  %v839_v38 = vand.u32 2147483648, %v1468_v45  ;;  %v856_v30 = vsel %vm853_vm6, %v855_v43, %v851_v27  ;;  %v811_v31 = vsel %vm808_vm7, %v810_v56, %v806_v28  ;;  %v901_v27 = vrot.slane %v1519_v18, 3 }
 0x16c   :  { %v903_v28 = vrot.slane %v1519_v18, 5 }
 0x16d   :  { %v840_v40 = vor.u32 1.1754944e-38, %v839_v38 }
 0x172   :  { %432 = vperm.xlu1 %1206, %v427_v41   ;;  %439 = vperm.xlu2 %1207, %v434_v42   ;;  %v836_v41 = vsel %vm835_vm1, %v1486_v62, %v832_v33  ;;  %v902_v33 = vrot.slane %v1519_v18, 4 }
 0x173   :  { %446 = vperm.xlu0 %1205, %v441_v44   ;;  %v841_v42 = vsel %vm838_vm2, %v840_v40, %v836_v41 }
 0x17a   :  { %453 = vperm.xlu1 %1206, %v448_v52   ;;  %467 = vperm.xlu2 %1207, %v462_v53  }
 0x17b   :  { %460 = vperm.xlu0 %1205, %v455_v57  }
 0x182   :  { %474 = vperm.xlu1 %1206, %v469_v8   ;;  %1210 = vset.pattern.permute.xlu2 %v1323_v32 }
 0x183   :  { %481 = vperm.xlu0 %1205, %v476_v48   ;;  %984 = vperm.xlu2 %1210, %v826_v13   ;;  %v1566_v13 = vld [vmem:[%s1832_s2] sm:$0xff] }
 0x184   :  { %v1838_v20 = vrot.slane %v1566_v13, 2 }
 0x18a   :  { %1208 = vset.pattern.permute.xlu1 %v1323_v32 }
 0x18b   :  { %1209 = vset.pattern.permute.xlu0 %v1323_v32  ;;  %897 = vperm.xlu1 %1208, %v796_v29  }
 0x18c   :  { %1039 = vperm.xlu2 %1210, %v856_v30   ;;  %980 = vperm.xlu0 %1209, %v811_v31   ;;  %v279_v36 = vpop.permute.xlu2 %278  ;;  %v899_v30 = vrot.slane %v1519_v18, 1 }
 0x18d   :  { %v485_v32 = vmul.f32 %v279_v36, %v1372_v0  ;;  %v1839_v36 = vrot.slane %v1566_v13, 3 }
 0x18f   :  { %v527_v45 = vrot.slane %v485_v32, 4 }
 0x191   :  { %v528_v53 = vadd.f32 %v527_v45, %v485_v32  ;;  %v904_v45 = vrot.slane %v1519_v18, 6 }
 0x193   :  { %1034 = vperm.xlu1 %1208, %v841_v42   ;;  %v529_v60 = vrot.slane %v528_v53, 2  ;;  %v905_v42 = vrot.slane %v1519_v18, 7 }
 0x194   :  { %v286_v44 = vpop.permute.xlu2 %285 }
 0x195   :  { %v486_v50 = vmul.f32 %v286_v44, %v1372_v0  ;;  %v530_v3 = vadd.f32 %v529_v60, %v528_v53  ;;  %v1841_v60 = vrot.slane %v1566_v13, 4 }
 0x197   :  { %v533_v51 = vrot.slane %v486_v50, 4  ;;  %v531_v14 = vrot.slane %v530_v3, 1 }
 0x199   :  { %v534_v58 = vadd.f32 %v533_v51, %v486_v50  ;;  %v532_v23 = vadd.f32 %v531_v14, %v530_v3  ;;  %v1584_v51 = vld [vmem:[#allocation5] sm:$0xff] }
 0x19a   :  { %v1843_v14 = vrot.slane %v1584_v51, 6 }
 0x19b   :  { %v535_v1 = vrot.slane %v534_v58, 2  ;;  %v877_v44 = vadd.f32 %v1838_v20, %v532_v23 }
 0x19c   :  { %v300_v46 = vpop.permute.xlu2 %299 }
 0x19d   :  { %v488_v52 = vmul.f32 %v300_v46, %v1372_v0  ;;  %v536_v48 = vadd.f32 %v535_v1, %v534_v58 }
 0x19f   :  { %v545_v59 = vrot.slane %v488_v52, 4  ;;  %v537_v21 = vrot.slane %v536_v48, 1 }
 0x1a1   :  { %v546_v2 = vadd.f32 %v545_v59, %v488_v52  ;;  %v538_v40 = vadd.f32 %v537_v21, %v536_v48  ;;  %v860_v52 = vrot.slane %v1566_v13, 1  ;;  %v1840_v59 = vrot.slane %v1584_v51, 3 }
 0x1a3   :  { %v547_v11 = vrot.slane %v546_v2, 2 }
 0x1a4   :  { %v321_v34 = vpop.permute.xlu2 %320  ;;  %v272_v47 = vpop.permute.xlu1 %271 }
 0x1a5   :  { %v265_v49 = vpop.permute.xlu0 %264  ;;  %v491_v61 = vmul.f32 %v321_v34, %v1372_v0  ;;  %v484_v62 = vmul.f32 %v272_v47, %v1372_v0  ;;  %v548_v22 = vadd.f32 %v547_v11, %v546_v2  ;;  %v1837_v47 = vrot.slane %v1566_v13, 5 }
 0x1a6   :  { %v483_v63 = vmul.f32 %v265_v49, %v1372_v0 }
 0x1a7   :  { %v563_v5 = vrot.slane %v491_v61, 4  ;;  %v521_v6 = vrot.slane %v484_v62, 4  ;;  %v549_v41 = vrot.slane %v548_v22, 1 }
 0x1a8   :  { %v515_v9 = vrot.slane %v483_v63, 4 }
 0x1a9   :  { %v564_v15 = vadd.f32 %v563_v5, %v491_v61  ;;  %v522_v12 = vadd.f32 %v521_v6, %v484_v62  ;;  %v550_v58 = vadd.f32 %v549_v41, %v548_v22  ;;  %v1592_v61 = vmul.f32 %v900_v26, %v877_v44 }
 0x1aa   :  { %v516_v17 = vadd.f32 %v515_v9, %v483_v63  ;;  %v1842_v6 = vrot.slane %v1566_v13, 7  ;;  %v1844_v44 = vrot.slane %v1584_v51, 4 }
 0x1ab   :  { %v565_v24 = vrot.slane %v564_v15, 2  ;;  %v523_v25 = vrot.slane %v522_v12, 2 }
 0x1ac   :  { %v342_v54 = vpop.permute.xlu2 %341  ;;  %v293_v55 = vpop.permute.xlu1 %292  ;;  %v517_v29 = vrot.slane %v516_v17, 2 }
 0x1ad   :  { %v314_v57 = vpop.permute.xlu0 %313  ;;  %v487_v16 = vmul.f32 %v293_v55, %v1372_v0  ;;  %v494_v37 = vmul.f32 %v342_v54, %v1372_v0  ;;  %v566_v46 = vadd.f32 %v565_v24, %v564_v15  ;;  %v524_v32 = vadd.f32 %v523_v25, %v522_v12 }
 0x1ae   :  { %v490_v19 = vmul.f32 %v314_v57, %v1372_v0  ;;  %v518_v49 = vadd.f32 %v517_v29, %v516_v17  ;;  %v878_v57 = vadd.f32 %v1839_v36, %v538_v40  ;;  %v865_v17 = vrot.slane %v1566_v13, 6 }
 0x1af   :  { %v539_v39 = vrot.slane %v487_v16, 4  ;;  %v581_v31 = vrot.slane %v494_v37, 4  ;;  %v567_v62 = vrot.slane %v566_v46, 1  ;;  %v525_v63 = vrot.slane %v524_v32, 1 }
 0x1b0   :  { %v557_v35 = vrot.slane %v490_v19, 4  ;;  %v519_v5 = vrot.slane %v518_v49, 1  ;;  %v1597_v12 = vmul.f32 %v901_v27, %v878_v57  ;;  %v951_v40 = vrot.slane %v1584_v51, 5 }
 0x1b1   :  { %v540_v34 = vadd.f32 %v539_v39, %v487_v16  ;;  %v582_v53 = vadd.f32 %v581_v31, %v494_v37  ;;  %v880_v16 = vadd.f32 %v1837_v47, %v550_v58  ;;  %v948_v37 = vrot.slane %v1584_v51, 2 }
 0x1b2   :  { %v558_v54 = vadd.f32 %v557_v35, %v490_v19  ;;  %v568_v19 = vadd.f32 %v567_v62, %v566_v46  ;;  %v526_v21 = vadd.f32 %v525_v63, %v524_v32  ;;  %v520_v23 = vadd.f32 %v519_v5, %v518_v49  ;;  %v1621_v62 = vld [vmem:[%s1830_s0] sm:$0xff] }
 0x1b3   :  { %v541_v1 = vrot.slane %v540_v34, 2  ;;  %v583_v48 = vrot.slane %v582_v53, 2  ;;  %v947_v31 = vrot.slane %v1584_v51, 1  ;;  %v1606_v35 = vmul.f32 %v903_v28, %v880_v16 }
 0x1b4   :  { %v363_v7 = vpop.permute.xlu2 %362  ;;  %v307_v8 = vpop.permute.xlu1 %306  ;;  %v559_v11 = vrot.slane %v558_v54, 2  ;;  %v876_v46 = vadd.f32 %v860_v52, %v526_v21  ;;  %v875_v49 = vadd.f32 %v1566_v13, %v520_v23 }
 0x1b5   :  { %v335_v10 = vpop.permute.xlu0 %334  ;;  %v497_v50 = vmul.f32 %v363_v7, %v1372_v0  ;;  %v489_v55 = vmul.f32 %v307_v8, %v1372_v0  ;;  %v542_v22 = vadd.f32 %v541_v1, %v540_v34  ;;  %v584_v26 = vadd.f32 %v583_v48, %v582_v53  ;;  %v1627_v1 = vld [vmem:[%s1830_s0 + $0x8] sm:$0xff]  ;;  %s1324_s0 = smov [#allocation7]  }
 0x1b6   :  { %v493_v8 = vmul.f32 %v335_v10, %v1372_v0  ;;  %v560_v27 = vadd.f32 %v559_v11, %v558_v54  ;;  %s1176_s22 = sshll.u32 %s1324_s0, 4  ;;  %s1177_s22 = int_to_ptr.vmem [resolvable:$true] %s1176_s22 }
 0x1b7   :  { %v599_v7 = vrot.slane %v497_v50, 4  ;;  %v551_v15 = vrot.slane %v489_v55, 4 }
 0x1b8   :  { %v575_v25 = vrot.slane %v493_v8, 4 }
 0x1b9   :  { %v600_v24 = vadd.f32 %v599_v7, %v497_v50  ;;  %v552_v29 = vadd.f32 %v551_v15, %v489_v55  ;;  %v585_v55 = vrot.slane %v584_v26, 1 }
 0x1ba   :  { %v576_v50 = vadd.f32 %v575_v25, %v493_v8  ;;  %v1633_v8 = vmul.f32 %v899_v30, %v876_v46  ;;  %v1639_v30 = vmul.f32 %v1519_v18, %v875_v49 }
 0x1bb   :  { %v601_v28 = vrot.slane %v600_v24, 2  ;;  %v586_v23 = vadd.f32 %v585_v55, %v584_v26 }
 0x1bc   :  { %v328_v43 = vpop.permute.xlu1 %327  ;;  %v384_v56 = vpop.permute.xlu2 %383 }
 0x1bd   :  { %v356_v38 = vpop.permute.xlu0 %355  ;;  %v492_v10 = vmul.f32 %v328_v43, %v1372_v0  ;;  %v500_v39 = vmul.f32 %v384_v56, %v1382_v4  ;;  %v1612_v43 = vadd.f32 %v1584_v51, %v568_v19  ;;  %v543_v4 = vrot.slane %v542_v22, 1 }
 0x1be   :  { %v496_v41 = vmul.f32 %v356_v38, %v1372_v0  ;;  %v561_v0 = vrot.slane %v560_v27, 1  ;;  %v553_v38 = vrot.slane %v552_v29, 2  ;;  %v602_v16 = vadd.f32 %v601_v28, %v600_v24 }
 0x1bf   :  { %v569_v56 = vrot.slane %v492_v10, 4  ;;  %v617_v53 = vrot.slane %v500_v39, 4  ;;  %v544_v48 = vadd.f32 %v543_v4, %v542_v22  ;;  %v577_v19 = vrot.slane %v576_v50, 2 }
 0x1c0   :  { %v593_v58 = vrot.slane %v496_v41, 4  ;;  %v562_v25 = vadd.f32 %v561_v0, %v560_v27  ;;  %v554_v47 = vadd.f32 %v553_v38, %v552_v29  ;;  %v603_v46 = vrot.slane %v602_v16, 1 }
 0x1c1   :  { %v570_v11 = vadd.f32 %v569_v56, %v492_v10  ;;  %v879_v22 = vadd.f32 %v1841_v60, %v544_v48  ;;  %v578_v4 = vadd.f32 %v577_v19, %v576_v50 }
 0x1c2   :  { %v594_v20 = vadd.f32 %v593_v58, %v496_v41  ;;  %v1645_v41 = vadd.f32 %v1840_v59, %v586_v23  ;;  %v604_v48 = vadd.f32 %v603_v46, %v602_v16 }
 0x1c3   :  { %v571_v10 = vrot.slane %v570_v11, 2  ;;  %v1651_v50 = vmul.f32 %v902_v33, %v879_v22  ;;  %v579_v19 = vrot.slane %v578_v4, 1 }
 0x1c4   :  { %v349_v2 = vpop.permute.xlu1 %348  ;;  %v405_v3 = vpop.permute.xlu2 %404  ;;  %v595_v28 = vrot.slane %v594_v20, 2 }
 0x1c5   :  { %v377_v9 = vpop.permute.xlu0 %376  ;;  %v495_v63 = vmul.f32 %v1621_v62, %v349_v2  ;;  %v503_v5 = vmul.f32 %v1627_v1, %v405_v3  ;;  %v618_v2 = vadd.f32 %v617_v53, %v500_v39  ;;  %v572_v0 = vadd.f32 %v571_v10, %v570_v11 }
 0x1c6   :  { %v499_v7 = vmul.f32 %v1627_v1, %v377_v9 }
 0x1c7   :  { %v587_v9 = vrot.slane %v495_v63, 4  ;;  %v635_v36 = vrot.slane %v503_v5, 4  ;;  %v619_v26 = vrot.slane %v618_v2, 2  ;;  %v573_v11 = vrot.slane %v572_v0, 1 }
 0x1c8   :  { %v611_v57 = vrot.slane %v499_v7, 4 }
 0x1c9   :  { %v588_v53 = vadd.f32 %v587_v9, %v495_v63  ;;  %v620_v23 = vadd.f32 %v619_v26, %v618_v2  ;;  %v580_v2 = vadd.f32 %v579_v19, %v578_v4 }
 0x1ca   :  { %v612_v55 = vadd.f32 %v611_v57, %v499_v7 }
 0x1cb   :  { %v589_v57 = vrot.slane %v588_v53, 2  ;;  %v1669_v4 = vadd.f32 %v948_v37, %v580_v2 }
 0x1cc   :  { %v370_v32 = vpop.permute.xlu1 %369  ;;  %v440_v34 = vpop.permute.xlu2 %439  ;;  %v613_v7 = vrot.slane %v612_v55, 2 }
 0x1cd   :  { %v398_v54 = vpop.permute.xlu0 %397  ;;  %v498_v15 = vmul.f32 %v1621_v62, %v370_v32  ;;  %v508_v21 = vmul.f32 %v1627_v1, %v440_v34  ;;  %v882_v32 = vadd.f32 %v1842_v6, %v562_v25  ;;  %v555_v34 = vrot.slane %v554_v47, 1 }
 0x1ce   :  { %v502_v3 = vmul.f32 %v1627_v1, %v398_v54  ;;  %v636_v54 = vadd.f32 %v635_v36, %v503_v5  ;;  %v596_v36 = vadd.f32 %v595_v28, %v594_v20  ;;  %v590_v46 = vadd.f32 %v589_v57, %v588_v53 }
 0x1cf   :  { %v605_v24 = vrot.slane %v498_v15, 4  ;;  %v665_v27 = vrot.slane %v508_v21, 4  ;;  %v556_v60 = vadd.f32 %v555_v34, %v554_v47  ;;  %v1658_v33 = vmul.f32 %v905_v42, %v882_v32 }
 0x1d0   :  { %v629_v49 = vrot.slane %v502_v3, 4  ;;  %v637_v5 = vrot.slane %v636_v54, 2  ;;  %v1662_v47 = vadd.f32 %v1843_v14, %v604_v48  ;;  %v597_v42 = vrot.slane %v596_v36, 1 }
 0x1d1   :  { %v606_v38 = vadd.f32 %v605_v24, %v498_v15  ;;  %v666_v59 = vadd.f32 %v665_v27, %v508_v21  ;;  %v621_v21 = vrot.slane %v620_v23, 1  ;;  %v881_v20 = vadd.f32 %v865_v17, %v556_v60 }
 0x1d2   :  { %v630_v25 = vadd.f32 %v629_v49, %v502_v3  ;;  %v638_v26 = vadd.f32 %v637_v5, %v636_v54  ;;  %v614_v27 = vadd.f32 %v613_v7, %v612_v55 }
 0x1d3   :  { %v607_v15 = vrot.slane %v606_v38, 2  ;;  %v667_v3 = vrot.slane %v666_v59, 2  ;;  %v622_v49 = vadd.f32 %v621_v21, %v620_v23  ;;  %v1674_v48 = vmul.f32 %v904_v45, %v881_v20 }
 0x1d4   :  { %v391_v39 = vpop.permute.xlu1 %390  ;;  %v468_v29 = vpop.permute.xlu2 %467  ;;  %v631_v10 = vrot.slane %v630_v25, 2  ;;  %v615_v19 = vrot.slane %v614_v27, 1 }
 0x1d5   :  { %v419_v56 = vpop.permute.xlu0 %418  ;;  %v512_v58 = vmul.f32 %v1627_v1, %v468_v29  ;;  %v501_v6 = vmul.f32 %v1627_v1, %v391_v39  ;;  %v574_v29 = vadd.f32 %v573_v11, %v572_v0  ;;  %v668_v28 = vadd.f32 %v667_v3, %v666_v59 }
 0x1d6   :  { %v505_v63 = vmul.f32 %v1627_v1, %v419_v56  ;;  %v608_v56 = vadd.f32 %v607_v15, %v606_v38  ;;  %v632_v53 = vadd.f32 %v631_v10, %v630_v25  ;;  %v598_v0 = vadd.f32 %v597_v42, %v596_v36 }
 0x1d7   :  { %v689_v16 = vrot.slane %v512_v58, 4  ;;  %v623_v24 = vrot.slane %v501_v6, 4  ;;  %v591_v38 = vrot.slane %v590_v46, 1  ;;  %v1678_v57 = vadd.f32 %v947_v31, %v574_v29 }
 0x1d8   :  { %v647_v39 = vrot.slane %v505_v63, 4  ;;  %v609_v5 = vrot.slane %v608_v56, 1  ;;  %v1682_v18 = vadd.f32 %v860_v52, %v622_v49  ;;  %v669_v45 = vrot.slane %v668_v28, 1 }
 0x1d9   :  { %v690_v32 = vadd.f32 %v689_v16, %v512_v58  ;;  %v624_v54 = vadd.f32 %v623_v24, %v501_v6  ;;  %v639_v58 = vrot.slane %v638_v26, 1  ;;  %v633_v36 = vrot.slane %v632_v53, 1 }
 0x1da   :  { %v648_v55 = vadd.f32 %v647_v39, %v505_v63  ;;  %v616_v21 = vadd.f32 %v615_v19, %v614_v27  ;;  %v1690_v39 = vadd.f32 %v951_v40, %v598_v0  ;;  %v670_v42 = vadd.f32 %v669_v45, %v668_v28 }
 0x1db   :  { %v691_v23 = vrot.slane %v690_v32, 2  ;;  %v625_v11 = vrot.slane %v624_v54, 2  ;;  %v640_v2 = vadd.f32 %v639_v58, %v638_v26  ;;  %v1853_v27 = vrot.slane %v1566_v13, 4 }
 0x1dc   :  { %v412_v9 = vpop.permute.xlu1 %411  ;;  %v649_v15 = vrot.slane %v648_v55, 2  ;;  %v1854_v28 = vrot.slane %v1584_v51, 7 }
 0x1dd   :  { %v426_v22 = vpop.permute.xlu0 %425  ;;  %v504_v34 = vmul.f32 %v1627_v1, %v412_v9  ;;  %v592_v9 = vadd.f32 %v591_v38, %v590_v46  ;;  %v692_v20 = vadd.f32 %v691_v23, %v690_v32  ;;  %v1686_v24 = vpop.permute.xlu2 %984  ;;  %v626_v14 = vadd.f32 %v625_v11, %v624_v54 }
 0x1de   :  { %v506_v60 = vmul.f32 %v1627_v1, %v426_v22  ;;  %v610_v22 = vadd.f32 %v609_v5, %v608_v56  ;;  %v1698_v56 = vadd.f32 %v1853_v27, %v640_v2  ;;  %v1701_v32 = vadd.f32 %v1566_v13, %v616_v21 }
 0x1df   :  { %v641_v59 = vrot.slane %v504_v34, 4  ;;  %v1694_v26 = vadd.f32 %v1844_v44, %v592_v9  ;;  %v971_v38 = vadd.f32 %v947_v31, %v670_v42  ;;  %v993_v19 = vrot.slane %v1686_v24, 1 }
 0x1e0   :  { %v653_v25 = vrot.slane %v506_v60, 4  ;;  %v997_v11 = vrot.slane %v1686_v24, 5 }
 0x1e1   :  { %v642_v10 = vadd.f32 %v641_v59, %v504_v34  ;;  %v1855_v59 = vrot.slane %v1566_v13, 3 }
 0x1e2   :  { %v654_v29 = vadd.f32 %v653_v25, %v506_v60  ;;  %v1705_v60 = vadd.f32 %v1854_v28, %v610_v22  ;;  %v627_v25 = vrot.slane %v626_v14, 1 }
 0x1e3   :  { %v643_v54 = vrot.slane %v642_v10, 2 }
 0x1e4   :  { %v433_v7 = vpop.permute.xlu1 %432  ;;  %v655_v58 = vrot.slane %v654_v29, 2  ;;  %v628_v27 = vadd.f32 %v627_v25, %v626_v14 }
 0x1e5   :  { %v507_v6 = vmul.f32 %v1627_v1, %v433_v7  ;;  %v447_v63 = vpop.permute.xlu0 %446  ;;  %v634_v7 = vadd.f32 %v633_v36, %v632_v53  ;;  %v693_v53 = vrot.slane %v692_v20, 1  ;;  %v644_v2 = vadd.f32 %v643_v54, %v642_v10 }
 0x1e6   :  { %v509_v16 = vmul.f32 %v1627_v1, %v447_v63  ;;  %v650_v63 = vadd.f32 %v649_v15, %v648_v55  ;;  %v656_v22 = vadd.f32 %v655_v58, %v654_v29 }
 0x1e7   :  { %v659_v3 = vrot.slane %v507_v6, 4  ;;  %v1713_v45 = vadd.f32 %v1855_v59, %v634_v7  ;;  %v694_v31 = vadd.f32 %v693_v53, %v692_v20  ;;  %v995_v7 = vrot.slane %v1686_v24, 3 }
 0x1e8   :  { %v671_v52 = vrot.slane %v509_v16, 4  ;;  %v645_v29 = vrot.slane %v644_v2, 1 }
 0x1e9   :  { %v660_v49 = vadd.f32 %v659_v3, %v507_v6  ;;  %v651_v6 = vrot.slane %v650_v63, 1  ;;  %v975_v10 = vadd.f32 %v951_v40, %v694_v31 }
 0x1ea   :  { %v672_v46 = vadd.f32 %v671_v52, %v509_v16  ;;  %v1718_v52 = vmul.f32 %v993_v19, %v971_v38  ;;  %v657_v38 = vrot.slane %v656_v22, 1 }
 0x1eb   :  { %v661_v34 = vrot.slane %v660_v49, 2  ;;  %v652_v28 = vadd.f32 %v651_v6, %v650_v63 }
 0x1ec   :  { %v673_v55 = vrot.slane %v672_v46, 2  ;;  %v454_v0 = vpop.permute.xlu1 %453 }
 0x1ed   :  { %v510_v5 = vmul.f32 %v1627_v1, %v454_v0  ;;  %v461_v23 = vpop.permute.xlu0 %460  ;;  %v662_v15 = vadd.f32 %v661_v34, %v660_v49  ;;  %v1040_v0 = vpop.permute.xlu2 %1039  ;;  %v1734_v6 = vadd.f32 %v865_v17, %v652_v28 }
 0x1ee   :  { %v511_v36 = vmul.f32 %v1627_v1, %v461_v23  ;;  %v674_v16 = vadd.f32 %v673_v55, %v672_v46  ;;  %v996_v23 = vrot.slane %v1686_v24, 4  ;;  %v1727_v14 = vmul.f32 %v1627_v1, %v1040_v0 }
 0x1ef   :  { %v677_v9 = vrot.slane %v510_v5, 4  ;;  %v663_v49 = vrot.slane %v662_v15, 1  ;;  %v646_v0 = vadd.f32 %v645_v29, %v644_v2 }
 0x1f0   :  { %v683_v3 = vrot.slane %v511_v36, 4  ;;  %v675_v46 = vrot.slane %v674_v16, 1  ;;  %v1070_v28 = vrot.slane %v1727_v14, 2 }
 0x1f1   :  { %v678_v42 = vadd.f32 %v677_v9, %v510_v5  ;;  %v1856_v5 = vrot.slane %v1566_v13, 2  ;;  %v664_v9 = vadd.f32 %v663_v49, %v662_v15  ;;  %v1858_v49 = vrot.slane %v1584_v51, 3 }
 0x1f2   :  { %v684_v59 = vadd.f32 %v683_v3, %v511_v36  ;;  %v676_v31 = vadd.f32 %v675_v46, %v674_v16 }
 0x1f3   :  { %v679_v34 = vrot.slane %v678_v42, 2  ;;  %v885_v25 = vadd.f32 %v1856_v5, %v628_v27  ;;  %v1069_v27 = vrot.slane %v1727_v14, 1  ;;  %v970_v15 = vadd.f32 %v1584_v51, %v664_v9 }
 0x1f4   :  { %v685_v53 = vrot.slane %v684_v59, 2  ;;  %v475_v54 = vpop.permute.xlu1 %474  ;;  %v972_v16 = vadd.f32 %v948_v37, %v676_v31  ;;  %v1861_v31 = vrot.slane %v1686_v24, 2 }
 0x1f5   :  { %v680_v63 = vadd.f32 %v679_v34, %v678_v42  ;;  %v513_v58 = vmul.f32 %v1627_v1, %v475_v54  ;;  %v482_v19 = vpop.permute.xlu0 %481  ;;  %v1737_v34 = vmul.f32 %v997_v11, %v975_v10  ;;  %v658_v54 = vadd.f32 %v657_v38, %v656_v22 }
 0x1f6   :  { %v686_v40 = vadd.f32 %v685_v53, %v684_v59  ;;  %v514_v36 = vmul.f32 %v1627_v1, %v482_v19  ;;  %v1071_v1 = vrot.slane %v1727_v14, 3  ;;  %v1072_v11 = vrot.slane %v1727_v14, 4 }
 0x1f7   :  { %v681_v3 = vrot.slane %v680_v63, 1  ;;  %v695_v55 = vrot.slane %v513_v58, 4  ;;  %v1857_v22 = vrot.slane %v1566_v13, 5  ;;  %v1860_v53 = vrot.slane %v1566_v13, 7 }
 0x1f8   :  { %v687_v20 = vrot.slane %v686_v40, 1  ;;  %v701_v42 = vrot.slane %v514_v36, 4 }
 0x1f9   :  { %v682_v21 = vadd.f32 %v681_v3, %v680_v63  ;;  %v696_v44 = vadd.f32 %v695_v55, %v513_v58  ;;  %v888_v59 = vadd.f32 %v1857_v22, %v646_v0  ;;  %v890_v55 = vadd.f32 %v1860_v53, %v658_v54 }
 0x1fa   :  { %v688_v5 = vadd.f32 %v687_v20, %v686_v40  ;;  %v702_v17 = vadd.f32 %v701_v42, %v514_v36  ;;  %v1859_v20 = vrot.slane %v1584_v51, 4  ;;  %v1026_v3 = vmul.f32 %v1861_v31, %v972_v16 }
 0x1fb   :  { %v697_v2 = vrot.slane %v696_v44, 2  ;;  %v973_v46 = vadd.f32 %v1858_v49, %v682_v21  ;;  %v1024_v21 = vmul.f32 %v1686_v24, %v970_v15 }
 0x1fc   :  { %v974_v10 = vadd.f32 %v1859_v20, %v688_v5  ;;  %v703_v29 = vrot.slane %v702_v17, 2 }
 0x1fd   :  { %v698_v38 = vadd.f32 %v697_v2, %v696_v44  ;;  %v898_v63 = vpop.permute.xlu1 %897  ;;  %v1027_v54 = vmul.f32 %v995_v7, %v973_v46  ;;  %v1862_v7 = vrot.slane %v1584_v51, 6  ;;  %v1863_v46 = vrot.slane %v1584_v51, 7 }
 0x1fe   :  { %v704_v19 = vadd.f32 %v703_v29, %v702_v17  ;;  %v906_v40 = vrot.slane %v898_v63, 1  ;;  %v907_v36 = vrot.slane %v898_v63, 2  ;;  %v908_v42 = vrot.slane %v898_v63, 3  ;;  %v981_v13 = vpop.permute.xlu0 %980 }
 0x1ff   :  { %v699_v0 = vrot.slane %v698_v38, 1  ;;  %v1028_v44 = vmul.f32 %v996_v23, %v974_v10  ;;  %v937_v2 = vmul.f32 %v898_v63, %v1701_v32  ;;  %v909_v49 = vrot.slane %v898_v63, 4 }
 0x200   :  { %v705_v5 = vrot.slane %v704_v19, 1  ;;  %v910_v17 = vrot.slane %v898_v63, 5  ;;  %v938_v20 = vmul.f32 %v906_v40, %v1682_v18  ;;  %v911_v53 = vrot.slane %v898_v63, 6 }
 0x201   :  { %v700_v22 = vadd.f32 %v699_v0, %v698_v38  ;;  %v939_v9 = vmul.f32 %v907_v36, %v885_v25  ;;  %v986_v15 = vrot.slane %v981_v13, 1  ;;  %v940_v37 = vmul.f32 %v908_v42, %v1713_v45 }
 0x202   :  { %v706_v29 = vadd.f32 %v705_v5, %v704_v19  ;;  %v1052_v16 = vadd.f32 %v1024_v21, %v937_v2  ;;  %v987_v31 = vrot.slane %v981_v13, 2  ;;  %v988_v58 = vrot.slane %v981_v13, 3 }
 0x203   :  { %v976_v23 = vadd.f32 %v1862_v7, %v700_v22  ;;  %v989_v10 = vrot.slane %v981_v13, 4  ;;  %v990_v38 = vrot.slane %v981_v13, 5  ;;  %v941_v0 = vmul.f32 %v909_v49, %v1698_v56 }
 0x204   :  { %v977_v32 = vadd.f32 %v1863_v46, %v706_v29  ;;  %v1053_v18 = vadd.f32 %v1718_v52, %v938_v20  ;;  %v991_v19 = vrot.slane %v981_v13, 6  ;;  %v1016_v25 = vmul.f32 %v981_v13, %v1612_v43 }
 0x205   :  { %v1035_v40 = vpop.permute.xlu1 %1034  ;;  %v1054_v45 = vadd.f32 %v1026_v3, %v939_v9  ;;  %v992_v36 = vrot.slane %v981_v13, 7  ;;  %v1017_v21 = vmul.f32 %v986_v15, %v1678_v57  ;;  %v1018_v42 = vmul.f32 %v987_v31, %v1669_v4 }
 0x206   :  { %v1019_v5 = vmul.f32 %v988_v58, %v1645_v41  ;;  %v1020_v51 = vmul.f32 %v989_v10, %v1694_v26  ;;  %v1021_v2 = vmul.f32 %v990_v38, %v1690_v39  ;;  %v1022_v56 = vmul.f32 %v991_v19, %v1662_v47 }
 0x207   :  { %v1864_v52 = vrot.slane %v1686_v24, 6  ;;  %v1865_v43 = vrot.slane %v1686_v24, 7  ;;  %v1781_v9 = vadd.f32 %v1052_v16, %v1727_v14  ;;  %v1042_v57 = vmul.f32 %v1621_v62, %v1035_v40 }
 0x208   :  { %v1044_v4 = vadd.f32 %v1016_v25, %v1639_v30  ;;  %v1045_v41 = vadd.f32 %v1017_v21, %v1633_v8  ;;  %v912_v26 = vrot.slane %v898_v63, 7  ;;  %v942_v58 = vmul.f32 %v910_v17, %v888_v59 }
 0x209   :  { %v1030_v22 = vmul.f32 %v1864_v52, %v976_v23  ;;  %v1031_v49 = vmul.f32 %v1865_v43, %v977_v32  ;;  %v1046_v39 = vadd.f32 %v1018_v42, %v1592_v61  ;;  %v1047_v47 = vadd.f32 %v1019_v5, %v1597_v12 }
 0x20a   :  { %v1048_v3 = vadd.f32 %v1020_v51, %v1651_v50  ;;  %v943_v24 = vmul.f32 %v911_v53, %v1734_v6  ;;  %v944_v13 = vmul.f32 %v912_v26, %v890_v55  ;;  %v1023_v20 = vmul.f32 %v992_v36, %v1705_v60 }
 0x20b   :  { %v1049_v29 = vadd.f32 %v1021_v2, %v1606_v35  ;;  %v1050_v62 = vadd.f32 %v1022_v56, %v1674_v48  ;;  %v1055_v30 = vadd.f32 %v1027_v54, %v940_v37  ;;  %v1056_v15 = vadd.f32 %v1028_v44, %v941_v0 }
 0x20c   :  { %v1062_v8 = vrot.slane %v1042_v57, 1  ;;  %v1063_v63 = vrot.slane %v1042_v57, 2  ;;  %v1057_v59 = vadd.f32 %v1737_v34, %v942_v58  ;;  %v1064_v61 = vrot.slane %v1042_v57, 3 }
 0x20d   :  { %v1065_v17 = vrot.slane %v1042_v57, 4  ;;  %v1066_v12 = vrot.slane %v1042_v57, 5  ;;  %v1058_v16 = vadd.f32 %v1030_v22, %v943_v24  ;;  %v1067_v50 = vrot.slane %v1042_v57, 6 }
 0x20e   :  { %v1068_v31 = vrot.slane %v1042_v57, 7  ;;  %v1093_v6 = vadd.f32 %v1062_v8, %v1045_v41  ;;  %v1051_v55 = vadd.f32 %v1023_v20, %v1658_v33  ;;  %v1059_v60 = vadd.f32 %v1031_v49, %v944_v13 }
 0x20f   :  { %v1094_v53 = vadd.f32 %v1063_v63, %v1046_v39  ;;  %v1095_v35 = vadd.f32 %v1064_v61, %v1047_v47  ;;  %v1096_v7 = vadd.f32 %v1065_v17, %v1048_v3  ;;  %v1097_v48 = vadd.f32 %v1066_v12, %v1049_v29 }
 0x210   :  { %v1101_v37 = vadd.f32 %v1069_v27, %v1053_v18  ;;  %v1102_v34 = vadd.f32 %v1070_v28, %v1054_v45  ;;  %v1092_v54 = vadd.f32 %v1044_v4, %v1042_v57  ;;  %v1098_v44 = vadd.f32 %v1067_v50, %v1050_v62 }
 0x211   :  { %v1099_v23 = vadd.f32 %v1068_v31, %v1051_v55  ;;  %v1103_v46 = vadd.f32 %v1071_v1, %v1055_v30  ;;  %v1104_v33 = vadd.f32 %v1072_v11, %v1056_v15  ;;  %v1866_v32 = vrot.slane %v1727_v14, 6 }
 0x212   :  { %v1109_v38 = vmax.f32 %v1093_v6, 0.0  ;;  %v1110_v0 = vmax.f32 %v1094_v53, 0.0  ;;  %v1116_v19 = vmax.f32 %v1781_v9, 0.0  ;;  %v1867_v27 = vrot.slane %v1727_v14, 5 }
 0x213   :  { %v1106_v10 = vadd.f32 %v1866_v32, %v1058_v16  ;;  %v1868_v28 = vrot.slane %v1727_v14, 7  ;;  %v1111_v40 = vmax.f32 %v1095_v35, 0.0  ;;  %v1112_v45 = vmax.f32 %v1096_v7, 0.0 }
 0x214   :  { %v1105_v18 = vadd.f32 %v1867_v27, %v1057_v59  ;;  %v1113_v36 = vmax.f32 %v1097_v48, 0.0  ;;  %v1117_v1 = vmax.f32 %v1101_v37, 0.0  ;;  %v1118_v21 = vmax.f32 %v1102_v34, 0.0 }
 0x215   :  { %v1107_v25 = vadd.f32 %v1868_v28, %v1059_v60  ;;  %v1108_v42 = vmax.f32 %v1092_v54, 0.0  ;;  %v1114_v11 = vmax.f32 %v1098_v44, 0.0  ;;  %v1115_v5 = vmax.f32 %v1099_v23, 0.0 }
 0x216   :  { %v1119_v51 = vmax.f32 %v1103_v46, 0.0  ;;  %v1120_v2 = vmax.f32 %v1104_v33, 0.0  ;;  %v1122_v56 = vmax.f32 %v1106_v10, 0.0  ;;  %v1140_v52 = vrot.slane %v1109_v38, 7 }
 0x217   :  { %v1142_v22 = vrot.slane %v1110_v0, 6  ;;  %v1121_v43 = vmax.f32 %v1105_v18, 0.0  ;;  %v1123_v49 = vmax.f32 %v1107_v25, 0.0  ;;  %v1144_v9 = vrot.slane %v1111_v40, 5 }
 0x218   :  { %v1154_v57 = vrot.slane %v1117_v1, 7  ;;  %v1141_v14 = vsel %vm232_vm10, %v1140_v52, %v1108_v42  ;;  %v1146_v4 = vrot.slane %v1112_v45, 4  ;;  %v1148_v41 = vrot.slane %v1113_v36, 3 }
 0x219   :  { %v1156_v26 = vrot.slane %v1118_v21, 6  ;;  %v1143_v58 = vsel %vm234_vm11, %v1142_v22, %v1141_v14  ;;  %v1150_v39 = vrot.slane %v1114_v11, 2  ;;  %v1158_v3 = vrot.slane %v1119_v51, 5 }
 0x21a   :  { %v1155_v47 = vsel %vm232_vm10, %v1154_v57, %v1116_v19  ;;  %v1145_v24 = vsel %vm236_vm12, %v1144_v9, %v1143_v58  ;;  %v1160_v20 = vrot.slane %v1120_v2, 4  ;;  %v1164_v29 = vrot.slane %v1122_v56, 2 }
 0x21b   :  { %v1157_v13 = vsel %vm234_vm11, %v1156_v26, %v1155_v47  ;;  %v1147_v62 = vsel %vm238_vm13, %v1146_v4, %v1145_v24  ;;  %v1162_v15 = vrot.slane %v1121_v43, 3  ;;  %v1166_v8 = vrot.slane %v1123_v49, 1 }
 0x21c   :  { %v1159_v30 = vsel %vm236_vm12, %v1158_v3, %v1157_v13  ;;  %v1149_v63 = vsel %vm240_vm14, %v1148_v41, %v1147_v62  ;;  %v1152_v59 = vrot.slane %v1115_v5, 1 }
 0x21d   :  { %v1161_v61 = vsel %vm238_vm13, %v1160_v20, %v1159_v30  ;;  %v1151_v17 = vsel %vm242_vm15, %v1150_v39, %v1149_v63 }
 0x21e   :  { %v1163_v12 = vsel %vm240_vm14, %v1162_v15, %v1161_v61  ;;  %v1153_v16 = vsel %vm244_vm0, %v1152_v59, %v1151_v17 }
 0x21f   :  { %v1165_v50 = vsel %vm242_vm15, %v1164_v29, %v1163_v12  ;;  %1170 = vst [vmem:[#allocation7] sm:$0xff] %v1153_v16 }
 0x220   :  { %v1167_v31 = vsel %vm244_vm0, %v1166_v8, %v1165_v50 }
 0x221   :  { %1171 = vst [vmem:[#allocation7 + $0x8] sm:$0xff] %v1167_v31 }
 0x222   :  { %1184 = dma.vmem_to_hbm [thread:$0]  %s1177_s22, 256, %s1179_s25, [#allocation4], %s1320_s29, %s1320_s29, %s1321_s30  }
 0x223   :  { %1317 = dma.done.wait [#allocation4], 256  }
 0x224   :  { %1318 = vsyncadd [#allocation4], 4294967040 }
 0x225   :  { %1189 = vsyncpa [#allocation3], 1 }
 0x226   :  { %1190 = vsyncpa [#allocation6], 1 }
 0x227   :  { %1191 = vsyncpa [#allocation4], 1 }

</bundles_post_ra>
